<compile_context>
chip_gen: v6e
topology: v6e:2x2x1
jax: 0.10.0
libtpu: 0.0.40
codegen_flags: <defaults>
</compile_context>

<pallas_src>
import functools

import numpy as np
import jax
import jax.numpy as jnp
from jax.experimental import pallas as pl
from jax.experimental.pallas import tpu as pltpu

TRUNK = 3
NEG_BIG = -1e30                      # safe "minus infinity" for masked logits
ENERGY_LEVELS = tuple((np.array([13, 8, 5, 3, 2, 1]) / 32).tolist())


# ----------------------------------------------------------------------------
# Small helpers (chip-aware sizing)
# ----------------------------------------------------------------------------

def _round_up(x, m):
    return ((x + m - 1) // m) * m


@functools.lru_cache(maxsize=None)
def _tpu_vmem_capacity():
    try:
        return int(pltpu.get_tpu_info().vmem_capacity_bytes)
    except Exception:
        return 64 * 1024 * 1024          # conservative (v7x per-core VMEM)


def _vmem_limit_bytes():
    cap = _tpu_vmem_capacity()
    return int(min(cap * 3 // 4, 96 * 1024 * 1024))


def _chain_bt(b, t, d, h, p):
    """Batches per chain grid step, sized by per-batch VMEM footprint.

    Returns a divisor of b so no batch padding is needed.
    """
    per_b = 4 * 3 * t * t                # s / exp / prob f32 temporaries
    per_b += 2 * 2 * 2 * t * t           # ke & fc bf16 outputs, double-buffered
    per_b += 2 * 2 * t * p               # packed bf16 output, double-buffered
    per_b += 2 * 4 * 2 * t * d           # x / xs_out f32 inputs, double-buffered
    per_b += 4 * t * (4 * h + 2 * d)     # z, k, q, h, oh working set
    budget = max(_vmem_limit_bytes() // 2, 1 << 20)
    cap = max(1, budget // max(per_b, 1))
    bt = 1
    for c in range(1, min(b, cap, 512) + 1):
        if b % c == 0:
            bt = c
    return bt


def _brew_tile(n, d, h):
    """N-tile for brew/energy: lane-aligned (>=128), sized by per-row footprint."""
    per_row = (2 * d * h                 # w_enc bf16
               + 3 * 4 * d * d           # w_hat / abs_w / wx f32
               + 4 * (4 * d + 2 * h)     # row vectors (f32)
               + 2 * (2 * d + h) + 4 * d)  # packed + start inputs
    budget = max(_vmem_limit_bytes() // 2, 1 << 20)
    nt = (budget // max(per_row, 1)) // 128 * 128
    nt = min(nt, 1024, _round_up(n, 128))
    return max(128, nt)


# ----------------------------------------------------------------------------
# Pallas kernels
# ----------------------------------------------------------------------------

def _chain_kernel(x_ref, xo_ref, v_ref, wkq_ref, bkq_ref, wd_ref, bd_ref,
                  ke_ref, fc_ref, pack_ref):
    """Fused per-batch-group chain:
       encoder_k|q -> kernel_explict -> masked attention -> decoder -> fc_mat,
       plus a lane-dense packed slab [xs_out_hat | ratio_q | ratio_d | pad]."""
    bt, t, d = x_ref.shape
    hdim = wd_ref.shape[0]
    p_lanes = pack_ref.shape[2]

    # encoder_k / encoder_q fused: one (Bt*T,D)@(D,2H) MXU dot (bf16 in, f32 acc)
    x2 = x_ref[...].reshape(bt * t, d)
    z = jnp.dot(x2.astype(jnp.bfloat16), wkq_ref[...],
                preferred_element_type=jnp.float32) + bkq_ref[...]      # (Bt*T, 2H)
    # NOTE: for production hdim (multiple of 128) these lane slices are
    # tile-aligned and free; at toy hdim they cost a tiny in-VMEM relayout.
    zk = z[:, :hdim]
    zq = z[:, hdim:]
    k = jnp.maximum(zk, 0.0)
    q = jnp.maximum(zq, 0.0)
    gq = (zq > 0.0).astype(jnp.bfloat16)          # ReLU gate == brew "ratio" (exact {0,1})

    kb = k.astype(jnp.bfloat16).reshape(bt, t, hdim)
    qb = q.astype(jnp.bfloat16).reshape(bt, t, hdim)

    # validity mask rebuilt in-kernel (no (B,T,T) HBM mask traffic)
    v = v_ref[...][:, 0, :]                       # (Bt, T), 1.0 == valid
    vm = v[:, :, None] * v[:, None, :]            # 1.0 where both positions valid

    # kernel_explict = k @ k^T
    ke = jnp.einsum('bik,bjk->bij', kb, kb, preferred_element_type=jnp.float32)
    ke_ref[...] = ke.astype(ke_ref.dtype)

    # masked scaled attention: kernel = softmax(k @ q^T / sqrt(H))
    s = jnp.einsum('bik,bjk->bij', kb, qb,
                   preferred_element_type=jnp.float32) * (1.0 / (hdim ** 0.5))
    s = jnp.where(vm < 0.5, NEG_BIG, s)
    s_max = jnp.max(s, axis=-1, keepdims=True)
    e = jnp.exp(s - s_max)
    prob = e * pl.reciprocal(jnp.sum(e, axis=-1, keepdims=True), approx=True)
    prob = jnp.where(vm < 0.5, 0.0, prob)
    h = jnp.einsum('bij,bjk->bik', prob.astype(jnp.bfloat16), qb,
                   preferred_element_type=jnp.float32)                  # (Bt, T, H)

    # decoder
    z2 = jnp.dot(h.reshape(bt * t, hdim).astype(jnp.bfloat16), wd_ref[...],
                 preferred_element_type=jnp.float32) + bd_ref[...]      # (Bt*T, D)
    oh = jnp.maximum(z2, 0.0)
    gd = (z2 > 0.0).astype(jnp.bfloat16)

    # fc_mat = xs_out[:, 0] @ xs_out_hat^T
    fc = jnp.einsum('bik,bjk->bij', xo_ref[...].astype(jnp.bfloat16),
                    oh.astype(jnp.bfloat16).reshape(bt, t, d),
                    preferred_element_type=jnp.float32)
    fc_ref[...] = fc.astype(fc_ref.dtype)

    # lane-dense packed slab: [oh | ratio_q | ratio_d | zero pad], bf16
    pack_ref[...] = jnp.zeros((bt, t, p_lanes), jnp.bfloat16)
    pack_ref[:, :, :d] = oh.astype(jnp.bfloat16).reshape(bt, t, d)
    pack_ref[:, :, d:d + hdim] = gq.reshape(bt, t, hdim)
    pack_ref[:, :, d + hdim:2 * d + hdim] = gd.reshape(bt, t, d)


def fused_chain(xs_in, xs_out0, valid, wkq_bf16, bkq, wd_bf16, bd, bt):
    """xs_in/xs_out0: (B,T,D); valid: (B,1,T); weights pre-cast to bf16."""
    B, T, D = xs_in.shape
    H2 = wkq_bf16.shape[1]
    H = H2 // 2
    P = _round_up(2 * D + H, 128)
    grid_b = B // bt
    return pl.pallas_call(
        _chain_kernel,
        out_shape=(jax.ShapeDtypeStruct((B, T, T), jnp.bfloat16),   # kernel_explict
                   jax.ShapeDtypeStruct((B, T, T), jnp.bfloat16),   # fc_mat
                   jax.ShapeDtypeStruct((B, T, P), jnp.bfloat16)),  # packed slab
        grid=(grid_b,),
        in_specs=[pl.BlockSpec((bt, T, D), lambda i: (i, 0, 0)),
                  pl.BlockSpec((bt, T, D), lambda i: (i, 0, 0)),
                  pl.BlockSpec((bt, 1, T), lambda i: (i, 0, 0)),
                  pl.BlockSpec((D, H2), lambda i: (0, 0)),
                  pl.BlockSpec((1, H2), lambda i: (0, 0)),
                  pl.BlockSpec((H, D), lambda i: (0, 0)),
                  pl.BlockSpec((1, D), lambda i: (0, 0))],
        out_specs=(pl.BlockSpec((bt, T, T), lambda i: (i, 0, 0)),
                   pl.BlockSpec((bt, T, T), lambda i: (i, 0, 0)),
                   pl.BlockSpec((bt, T, P), lambda i: (i, 0, 0))),
        compiler_params=pltpu.CompilerParams(
            dimension_semantics=("parallel",),
            vmem_limit_bytes=_vmem_limit_bytes()),
    )(xs_in, xs_out0, valid, wkq_bf16, bkq, wd_bf16, bd)


def _brew_energy_kernel(pack_ref, start_ref, wq_ref, bq_ref, wd_ref, bd_ref,
                        field_ref, ent_ref, rowsum_ref, e_ref):
    nt, d = start_ref.shape
    hdim = wq_ref.shape[1]

    pack = pack_ref[...]                           # (Nt, P) bf16
    oh = pack[:, :d].astype(jnp.float32)           # xs_pad_out_hat
    rq = pack[:, d:d + hdim]                       # encoder_q gate, {0,1} bf16
    rd = pack[:, d + hdim:2 * d + hdim]            # decoder gate,  {0,1} bf16
    start = start_ref[...]                         # (Nt, D) f32
    bq = bq_ref[...]                               # (1, H)
    bd = bd_ref[...]                               # (1, D)
    wd_b = wd_ref[...]                             # (H, D) bf16
    field = field_ref[...]                         # (D, D) f32
    ent = ent_ref[...]                             # (1, D)  sum_j field*log(field)
    rowsum = rowsum_ref[...]                       # (1, D)  sum_j field

    # brew_([encoder_q]) then brew_([decoder]): per-position linearization.
    # Gates are exact {0,1}, so a bf16 select replaces f32 multiply+casts.
    w_enc = jnp.where(rq[:, None, :] > 0, wq_ref[...][None, :, :], 0.0)   # (Nt,D,H) bf16
    w_pre = jnp.dot(w_enc.reshape(nt * d, hdim), wd_b,
                    preferred_element_type=jnp.float32).reshape(nt, d, d)
    rd_gate = rd > 0
    w_hat = jnp.where(rd_gate[:, None, :], w_pre, 0.0)                    # (Nt, D, D)
    bias_mm = jnp.dot(jnp.where(rq > 0, bq, 0.0).astype(jnp.bfloat16), wd_b,
                      preferred_element_type=jnp.float32)
    bias_hat = jnp.where(rd_gate, bias_mm + bd, 0.0)                      # (Nt, D)

    end = oh - bias_hat

    # distance = KL(field || softmax(|w_hat|)) summed over last dim, with the
    # field entropy / row-sum pieces precomputed outside the kernel:
    #   dist[n,i] = ent[i] - sum_j field[i,j]*|w|[n,i,j] + lse[n,i]*rowsum[i]
    abs_w = jnp.abs(w_hat)
    mx = jnp.max(abs_w, axis=-1, keepdims=True)
    lse = mx[:, :, 0] + jnp.log(jnp.sum(jnp.exp(abs_w - mx), axis=-1))    # (Nt, D)
    fdotabs = jnp.sum(field[None, :, :] * abs_w, axis=-1)                 # (Nt, D)
    distance = ent + lse * rowsum - fdotabs

    # freq: reuse abs_w; keep the (sgn != 0) mask to preserve sign(0) semantics.
    sgn = jnp.sign(start)[:, :, None] * jnp.sign(end)[:, None, :]
    wx = w_hat * sgn
    num = jnp.sum(jnp.where(wx > 0.0, abs_w, 0.0), axis=-1)
    den = jnp.sum(jnp.where(sgn != 0.0, abs_w, 0.0), axis=-1)
    freq = jnp.where(den > 0.0, num / jnp.maximum(den, 1e-30), 0.5)       # 0/0 -> 0.5

    # target_type == 'residual'
    energy = jnp.mean(distance * jnp.abs(start) * freq, axis=-1)          # (Nt,)
    e_ref[...] = energy.reshape(1, 1, nt)


def brew_energy(pack, start, wq_bf16, bq, wd_bf16, bd, field, ent, rowsum, nt):
    N, P = pack.shape
    D = start.shape[1]
    H = wq_bf16.shape[1]
    n_pad = _round_up(N, nt)
    if n_pad != N:
        pad = n_pad - N
        pack = jnp.pad(pack, ((0, pad), (0, 0)))
        start = jnp.pad(start, ((0, pad), (0, 0)))
    grid_n = n_pad // nt
    out = pl.pallas_call(
        _brew_energy_kernel,
        out_shape=jax.ShapeDtypeStruct((grid_n, 1, nt), jnp.float32),
        grid=(grid_n,),
        in_specs=[pl.BlockSpec((nt, P), lambda i: (i, 0)),
                  pl.BlockSpec((nt, D), lambda i: (i, 0)),
                  pl.BlockSpec((D, H), lambda i: (0, 0)),
                  pl.BlockSpec((1, H), lambda i: (0, 0)),
                  pl.BlockSpec((H, D), lambda i: (0, 0)),
                  pl.BlockSpec((1, D), lambda i: (0, 0)),
                  pl.BlockSpec((D, D), lambda i: (0, 0)),
                  pl.BlockSpec((1, D), lambda i: (0, 0)),
                  pl.BlockSpec((1, D), lambda i: (0, 0))],
        out_specs=pl.BlockSpec((1, 1, nt), lambda i: (i, 0, 0)),
        compiler_params=pltpu.CompilerParams(
            dimension_semantics=("parallel",),
            vmem_limit_bytes=_vmem_limit_bytes()),
    )(pack, start, wq_bf16, bq.reshape(1, H), wd_bf16, bd.reshape(1, D),
      field, ent, rowsum)
    return out.reshape(n_pad)[:N]


def _bce2_kernel(ke_ref, fc_ref, t_ref, v_ref, o_ref):
    """Both BCE-with-logits masked sums in one pass; mask rebuilt from (B,1,T)."""
    t = t_ref[...]                                 # targets (Bt, T, T) f32
    v = v_ref[...][:, 0, :]                        # (Bt, T), 1.0 == valid
    vm = v[:, :, None] * v[:, None, :]
    masked = jnp.logical_or(vm < 0.5, t < 0.1)

    def bce_sum(xr):
        x = xr[...].astype(jnp.float32)
        loss = jnp.maximum(x, 0.0) - x * t + jnp.log1p(jnp.exp(-jnp.abs(x)))
        return jnp.sum(jnp.where(masked, 0.0, loss))

    sk = bce_sum(ke_ref)                           # kernel_explict loss partial
    sg = bce_sum(fc_ref)                           # fc_mat loss partial
    lane = jax.lax.broadcasted_iota(jnp.int32, (1, 128), 1)
    o_ref[0] = jnp.where(lane == 0, sk, jnp.where(lane == 1, sg, 0.0))


def masked_bce_sum2(ke, fc, target, valid, bt):
    B, T, _ = ke.shape
    grid_b = B // bt
    spec_tt = pl.BlockSpec((bt, T, T), lambda i: (i, 0, 0))
    out = pl.pallas_call(
        _bce2_kernel,
        out_shape=jax.ShapeDtypeStruct((grid_b, 1, 128), jnp.float32),
        grid=(grid_b,),
        in_specs=[spec_tt, spec_tt, spec_tt,
                  pl.BlockSpec((bt, 1, T), lambda i: (i, 0, 0))],
        out_specs=pl.BlockSpec((1, 1, 128), lambda i: (i, 0, 0)),
        compiler_params=pltpu.CompilerParams(
            dimension_semantics=("parallel",),
            vmem_limit_bytes=_vmem_limit_bytes()),
    )(ke, fc, target, valid)
    loss_k = jnp.sum(out[:, 0, 0])
    loss_g = jnp.sum(out[:, 0, 1])
    return loss_k, loss_g


# ----------------------------------------------------------------------------
# Plain-JAX glue (target generation, masks, parameter setup)
# ----------------------------------------------------------------------------

def gaussian_func(x, m=0.0, sigma=1.0):
    norm = np.sqrt(2 * np.pi * sigma ** 2)
    dist = (x - m) ** 2 / (2 * sigma ** 2)
    return 1 / norm * np.exp(-dist)


def make_pad_mask(ilens, maxlen):
    t = jnp.arange(maxlen)[None, :]
    return t >= jnp.asarray(ilens)[:, None]          # True where padded


def energy_quantization(x, levels):
    x_past = None
    for el in levels:
        if x_past is None:
            x = jnp.where(x > el, el, x)
        else:
            x = jnp.where((x_past > x) & (x > el), el, x)
        x_past = el
    return x


def fb_batch(x, offset=1):
    """Forward cumulative-product target (mode='batch').  x: (B, 1, T) -> (B, 1, T, T)."""
    x0 = x[:, 0]
    T = x0.shape[-1]
    ones = jnp.ones((T, T), x0.dtype)
    m_f = jnp.triu(ones, k=1)

    def one(xb):
        xs = jnp.tile(xb[:, None], (1, T))
        xf = jnp.cumprod(jnp.tril(xs) + m_f, axis=-2)
        xf = jnp.concatenate([ones[0:offset], xf[:-offset]], axis=0) - m_f
        return xf

    return jax.vmap(one)(x0)[:, None]


def init_params(key, idim_full, hdim, field_var=13.0):
    D = idim_full - TRUNK
    ks = jax.random.split(key, 6)
    s = 0.1
    space = np.linspace(0, D - 1, D)
    field = np.stack([gaussian_func(space, i, field_var) for i in range(D)], axis=0)
    return {
        'wk': jax.random.normal(ks[0], (D, hdim), jnp.float32) * s,
        'bk': jax.random.normal(ks[1], (hdim,), jnp.float32) * s,
        'wq': jax.random.normal(ks[2], (D, hdim), jnp.float32) * s,
        'bq': jax.random.normal(ks[3], (hdim,), jnp.float32) * s,
        'wd': jax.random.normal(ks[4], (hdim, D), jnp.float32) * s,
        'bd': jax.random.normal(ks[5], (D,), jnp.float32) * s,
        'field': jnp.asarray(field, jnp.float32),     # (odim, odim)
    }


def net_transform_forward(params, xs_pad_in, xs_pad_out, ilens, ys_pad=None):
    ilens = np.asarray(ilens)
    T = int(ilens.max())
    B = xs_pad_in.shape[0]

    xs_in = xs_pad_in[:, :T, :-TRUNK].astype(jnp.float32)                     # (B, T, D)
    xs_out = jnp.transpose(xs_pad_out[:, :T, :, :-TRUNK],
                           (0, 2, 1, 3)).astype(jnp.float32)                  # (B, tnum, T, D)
    D = xs_in.shape[-1]
    H = params['wq'].shape[1]

    # (B,1,T) validity vector; the (B,T,T) mask is rebuilt inside the kernels.
    seq_mask = make_pad_mask(ilens, T)                                        # (B, T)
    valid = (~seq_mask).astype(jnp.float32).reshape(B, 1, T)

    # weights: fuse encoder_k|encoder_q, pre-cast MXU operands to bf16
    wkq = jnp.concatenate([params['wk'], params['wq']], axis=1).astype(jnp.bfloat16)
    bkq = jnp.concatenate([params['bk'], params['bq']], axis=0).reshape(1, 2 * H)
    wd_b = params['wd'].astype(jnp.bfloat16)
    wq_b = params['wq'].astype(jnp.bfloat16)

    # fused engine + attention + decoder + pairwise-kernel matrices (Pallas)
    P = _round_up(2 * D + H, 128)
    bt = _chain_bt(B, T, D, H, P)
    kernel_explict, fc_mat, pack = fused_chain(
        xs_in, xs_out[:, 0], valid, wkq, bkq, wd_b, params['bd'].reshape(1, D), bt)

    # brew_ + calculate_energy (target_type='residual'), tiled over N = B*T
    field = params['field']
    ent = jnp.sum(jnp.where(field > 0, field * jnp.log(field), 0.0),
                  axis=-1).reshape(1, D)                       # guarded 0*log(0)
    rowsum = jnp.sum(field, axis=-1).reshape(1, D)
    N = B * T
    nt = _brew_tile(N, D, H)
    energy = brew_energy(pack.reshape(N, P), xs_in.reshape(N, D),
                         wq_b, params['bq'], wd_b, params['bd'],
                         field, ent, rowsum, nt)
    energy_t = energy.reshape(B, 1, T)

    # targets (no_grad in the reference)
    energy_t_inv = 1.0 - energy_quantization(energy_t, ENERGY_LEVELS)
    kernel_target = fb_batch(energy_t_inv, offset=1)                          # (B, 1, T, T)
    # fc_target == kernel_target, so one pass over target/mask covers both losses.

    # SeqMultiMaskLoss(BCEWithLogitsLoss) + sum, both losses in one Pallas kernel
    loss_k, loss_g = masked_bce_sum2(kernel_explict, fc_mat,
                                     kernel_target[:, 0], valid, bt)
    return loss_g + loss_k


# ----------------------------------------------------------------------------
# Demo
# ----------------------------------------------------------------------------

if __name__ == "__main__":
    key = jax.random.PRNGKey(0)
    B, Tmax, idim_full, tnum, hdim = 2, 8, 19, 1, 32   # idim = odim = 19 - 3 = 16

    kp, k1, k2 = jax.random.split(key, 3)
    params = init_params(kp, idim_full, hdim, field_var=13.0)

    xs_pad_in = jax.random.normal(k1, (B, Tmax, idim_full), jnp.float32)
    xs_pad_out = jax.random.normal(k2, (B, Tmax, tnum, idim_full), jnp.float32)
    ilens = np.array([8, 6], dtype=np.int32)
    ys_pad = jnp.zeros((B, Tmax), jnp.int32)           # unused by forward

    loss = net_transform_forward(params, xs_pad_in, xs_pad_out, ilens, ys_pad)
    loss = jax.block_until_ready(loss)
    assert np.isfinite(float(loss)), "loss is not finite"
    print("KERNEL_OK")
</pallas_src>

<mosaic_0001>
module attributes {stable_mosaic.version = 11 : i64} {
  func.func @_chain_kernel(%arg0: i32, %arg1: memref<2x8x16xf32, #tpu.memory_space<vmem>>, %arg2: memref<2x8x16xf32, #tpu.memory_space<vmem>>, %arg3: memref<2x1x8xf32, #tpu.memory_space<vmem>>, %arg4: memref<16x64xbf16, #tpu.memory_space<vmem>>, %arg5: memref<1x64xf32, #tpu.memory_space<vmem>>, %arg6: memref<32x16xbf16, #tpu.memory_space<vmem>>, %arg7: memref<1x16xf32, #tpu.memory_space<vmem>>, %arg8: memref<2x8x8xbf16, #tpu.memory_space<vmem>>, %arg9: memref<2x8x8xbf16, #tpu.memory_space<vmem>>, %arg10: memref<2x8x128xbf16, #tpu.memory_space<vmem>>) attributes {dimension_semantics = [#tpu.dimension_semantics<parallel>], iteration_bounds = array<i64: 1>, scalar_prefetch = 0 : i64, scratch_operands = 0 : i64, tpu.core_type = #tpu.core_type<tc>, window_params = [{transform_indices = @transform_0, window_bounds = array<i64: 2, 8, 16>}, {transform_indices = @transform_1, window_bounds = array<i64: 2, 8, 16>}, {transform_indices = @transform_2, window_bounds = array<i64: 2, 1, 8>}, {pipeline_mode = #tpu.pipeline_mode<synchronous>, transform_indices = @transform_3, window_bounds = array<i64: 16, 64>}, {pipeline_mode = #tpu.pipeline_mode<synchronous>, transform_indices = @transform_4, window_bounds = array<i64: 1, 64>}, {pipeline_mode = #tpu.pipeline_mode<synchronous>, transform_indices = @transform_5, window_bounds = array<i64: 32, 16>}, {pipeline_mode = #tpu.pipeline_mode<synchronous>, transform_indices = @transform_6, window_bounds = array<i64: 1, 16>}, {transform_indices = @transform_7, window_bounds = array<i64: 2, 8, 8>}, {transform_indices = @transform_8, window_bounds = array<i64: 2, 8, 8>}, {transform_indices = @transform_9, window_bounds = array<i64: 2, 8, 128>}]} {
    %c0 = arith.constant 0 : index
    %c0_0 = arith.constant 0 : index
    %c0_1 = arith.constant 0 : index
    %0 = vector.load %arg1[%c0, %c0_0, %c0_1] : memref<2x8x16xf32, #tpu.memory_space<vmem>>, vector<2x8x16xf32>
    %1 = vector.shape_cast %0 : vector<2x8x16xf32> to vector<16x16xf32>
    %2 = arith.truncf %1 : vector<16x16xf32> to vector<16x16xbf16>
    %c0_2 = arith.constant 0 : index
    %c0_3 = arith.constant 0 : index
    %3 = vector.load %arg4[%c0_2, %c0_3] : memref<16x64xbf16, #tpu.memory_space<vmem>>, vector<16x64xbf16>
    %cst = arith.constant dense<0.000000e+00> : vector<16x64xf32>
    %4 = tpu.matmul %2, %3, %cst {dimension_numbers = #tpu.dot_dimension_numbers<[1], [0], [0], [1], [0, 0, 1, 1], [], []>} : vector<16x16xbf16>, vector<16x64xbf16>, vector<16x64xf32> -> vector<16x64xf32>
    %c0_4 = arith.constant 0 : index
    %c0_5 = arith.constant 0 : index
    %5 = vector.load %arg5[%c0_4, %c0_5] : memref<1x64xf32, #tpu.memory_space<vmem>>, vector<1x64xf32>
    %6 = vector.broadcast %5 : vector<1x64xf32> to vector<16x64xf32>
    %7 = arith.addf %4, %6 : vector<16x64xf32>
    %8 = vector.extract_strided_slice %7 {offsets = [0, 0], sizes = [16, 32], strides = [1, 1]} : vector<16x64xf32> to vector<16x32xf32>
    %9 = vector.extract_strided_slice %7 {offsets = [0, 32], sizes = [16, 32], strides = [1, 1]} : vector<16x64xf32> to vector<16x32xf32>
    %cst_6 = arith.constant 0.000000e+00 : f32
    %10 = vector.broadcast %cst_6 : f32 to vector<16x32xf32>
    %11 = arith.maximumf %8, %10 : vector<16x32xf32>
    %cst_7 = arith.constant 0.000000e+00 : f32
    %12 = vector.broadcast %cst_7 : f32 to vector<16x32xf32>
    %13 = arith.maximumf %9, %12 : vector<16x32xf32>
    %cst_8 = arith.constant 0.000000e+00 : f32
    %14 = vector.broadcast %cst_8 : f32 to vector<16x32xf32>
    %15 = arith.cmpf ogt, %9, %14 : vector<16x32xf32>
    %16 = arith.extui %15 : vector<16x32xi1> to vector<16x32xi32>
    %17 = arith.sitofp %16 : vector<16x32xi32> to vector<16x32xf32>
    %18 = arith.truncf %17 : vector<16x32xf32> to vector<16x32xbf16>
    %19 = arith.truncf %11 : vector<16x32xf32> to vector<16x32xbf16>
    %20 = vector.shape_cast %19 : vector<16x32xbf16> to vector<2x8x32xbf16>
    %21 = arith.truncf %13 : vector<16x32xf32> to vector<16x32xbf16>
    %22 = vector.shape_cast %21 : vector<16x32xbf16> to vector<2x8x32xbf16>
    %c0_9 = arith.constant 0 : index
    %c0_10 = arith.constant 0 : index
    %c0_11 = arith.constant 0 : index
    %23 = vector.load %arg3[%c0_9, %c0_10, %c0_11] : memref<2x1x8xf32, #tpu.memory_space<vmem>>, vector<2x1x8xf32>
    %24 = vector.shape_cast %23 : vector<2x1x8xf32> to vector<2x8xf32>
    %25 = vector.shape_cast %24 : vector<2x8xf32> to vector<2x8x1xf32>
    %26 = vector.shape_cast %24 : vector<2x8xf32> to vector<2x1x8xf32>
    %27 = vector.broadcast %25 : vector<2x8x1xf32> to vector<2x8x8xf32>
    %28 = vector.broadcast %26 : vector<2x1x8xf32> to vector<2x8x8xf32>
    %29 = arith.mulf %27, %28 : vector<2x8x8xf32>
    "tpu.trace_start"() <{level = 10 : i32, message = "bik,bjk->bij"}> : () -> ()
    %cst_12 = arith.constant dense<0.000000e+00> : vector<2x8x8xf32>
    %30 = tpu.matmul %20, %20, %cst_12 {dimension_numbers = #tpu.dot_dimension_numbers<[2], [2], [1], [1], [0, 0, 0, 1, 1, 1], [0], [0]>} : vector<2x8x32xbf16>, vector<2x8x32xbf16>, vector<2x8x8xf32> -> vector<2x8x8xf32>
    "tpu.trace_stop"() : () -> ()
    %31 = arith.truncf %30 : vector<2x8x8xf32> to vector<2x8x8xbf16>
    %c0_13 = arith.constant 0 : index
    %c0_14 = arith.constant 0 : index
    %c0_15 = arith.constant 0 : index
    %32 = vector.load %arg8[%c0_13, %c0_14, %c0_15] : memref<2x8x8xbf16, #tpu.memory_space<vmem>>, vector<2x8x8xbf16>
    tpu.vector_store %arg8[%c0_13, %c0_14, %c0_15], %31 {strides = array<i32>} : memref<2x8x8xbf16, #tpu.memory_space<vmem>>, vector<2x8x8xbf16>,
    "tpu.trace_start"() <{level = 10 : i32, message = "bik,bjk->bij"}> : () -> ()
    %cst_16 = arith.constant dense<0.000000e+00> : vector<2x8x8xf32>
    %33 = tpu.matmul %20, %22, %cst_16 {dimension_numbers = #tpu.dot_dimension_numbers<[2], [2], [1], [1], [0, 0, 0, 1, 1, 1], [0], [0]>} : vector<2x8x32xbf16>, vector<2x8x32xbf16>, vector<2x8x8xf32> -> vector<2x8x8xf32>
    "tpu.trace_stop"() : () -> ()
    %cst_17 = arith.constant 0.176776692 : f32
    %34 = vector.broadcast %cst_17 : f32 to vector<2x8x8xf32>
    %35 = arith.mulf %33, %34 : vector<2x8x8xf32>
    %cst_18 = arith.constant 5.000000e-01 : f32
    %36 = vector.broadcast %cst_18 : f32 to vector<2x8x8xf32>
    %37 = arith.cmpf olt, %29, %36 : vector<2x8x8xf32>
    %cst_19 = arith.constant -1.000000e+30 : f32
    %38 = vector.broadcast %cst_19 : f32 to vector<2x8x8xf32>
    %39 = arith.select %37, %38, %35 : vector<2x8x8xi1>, vector<2x8x8xf32>
    %cst_20 = arith.constant dense<0xFF800000> : vector<2x8xf32>
    %40 = vector.multi_reduction <maximumf>, %39, %cst_20 [2] : vector<2x8x8xf32> to vector<2x8xf32>
    %41 = vector.shape_cast %40 : vector<2x8xf32> to vector<2x8x1xf32>
    %42 = vector.broadcast %41 : vector<2x8x1xf32> to vector<2x8x8xf32>
    %43 = arith.subf %39, %42 : vector<2x8x8xf32>
    %44 = math.exp %43 : vector<2x8x8xf32>
    %cst_21 = arith.constant dense<0.000000e+00> : vector<2x8xf32>
    %45 = vector.multi_reduction <add>, %44, %cst_21 [2] : vector<2x8x8xf32> to vector<2x8xf32>
    %46 = vector.shape_cast %45 : vector<2x8xf32> to vector<2x8x1xf32>
    %47 = tpu.reciprocal %46 {approx = true} : vector<2x8x1xf32> -> vector<2x8x1xf32>
    %48 = vector.broadcast %47 : vector<2x8x1xf32> to vector<2x8x8xf32>
    %49 = arith.mulf %44, %48 : vector<2x8x8xf32>
    %cst_22 = arith.constant 5.000000e-01 : f32
    %50 = vector.broadcast %cst_22 : f32 to vector<2x8x8xf32>
    %51 = arith.cmpf olt, %29, %50 : vector<2x8x8xf32>
    %cst_23 = arith.constant 0.000000e+00 : f32
    %52 = vector.broadcast %cst_23 : f32 to vector<2x8x8xf32>
    %53 = arith.select %51, %52, %49 : vector<2x8x8xi1>, vector<2x8x8xf32>
    %54 = arith.truncf %53 : vector<2x8x8xf32> to vector<2x8x8xbf16>
    "tpu.trace_start"() <{level = 10 : i32, message = "bij,bjk->bik"}> : () -> ()
    %cst_24 = arith.constant dense<0.000000e+00> : vector<2x8x32xf32>
    %55 = tpu.matmul %54, %22, %cst_24 {dimension_numbers = #tpu.dot_dimension_numbers<[2], [1], [1], [2], [0, 0, 0, 1, 1, 2], [0], [0]>} : vector<2x8x8xbf16>, vector<2x8x32xbf16>, vector<2x8x32xf32> -> vector<2x8x32xf32>
    "tpu.trace_stop"() : () -> ()
    %56 = vector.shape_cast %55 : vector<2x8x32xf32> to vector<16x32xf32>
    %57 = arith.truncf %56 : vector<16x32xf32> to vector<16x32xbf16>
    %c0_25 = arith.constant 0 : index
    %c0_26 = arith.constant 0 : index
    %58 = vector.load %arg6[%c0_25, %c0_26] : memref<32x16xbf16, #tpu.memory_space<vmem>>, vector<32x16xbf16>
    %cst_27 = arith.constant dense<0.000000e+00> : vector<16x16xf32>
    %59 = tpu.matmul %57, %58, %cst_27 {dimension_numbers = #tpu.dot_dimension_numbers<[1], [0], [0], [1], [0, 0, 1, 1], [], []>} : vector<16x32xbf16>, vector<32x16xbf16>, vector<16x16xf32> -> vector<16x16xf32>
    %c0_28 = arith.constant 0 : index
    %c0_29 = arith.constant 0 : index
    %60 = vector.load %arg7[%c0_28, %c0_29] : memref<1x16xf32, #tpu.memory_space<vmem>>, vector<1x16xf32>
    %61 = vector.broadcast %60 : vector<1x16xf32> to vector<16x16xf32>
    %62 = arith.addf %59, %61 : vector<16x16xf32>
    %cst_30 = arith.constant 0.000000e+00 : f32
    %63 = vector.broadcast %cst_30 : f32 to vector<16x16xf32>
    %64 = arith.maximumf %62, %63 : vector<16x16xf32>
    %cst_31 = arith.constant 0.000000e+00 : f32
    %65 = vector.broadcast %cst_31 : f32 to vector<16x16xf32>
    %66 = arith.cmpf ogt, %62, %65 : vector<16x16xf32>
    %67 = arith.extui %66 : vector<16x16xi1> to vector<16x16xi32>
    %68 = arith.sitofp %67 : vector<16x16xi32> to vector<16x16xf32>
    %69 = arith.truncf %68 : vector<16x16xf32> to vector<16x16xbf16>
    %c0_32 = arith.constant 0 : index
    %c0_33 = arith.constant 0 : index
    %c0_34 = arith.constant 0 : index
    %70 = vector.load %arg2[%c0_32, %c0_33, %c0_34] : memref<2x8x16xf32, #tpu.memory_space<vmem>>, vector<2x8x16xf32>
    %71 = arith.truncf %70 : vector<2x8x16xf32> to vector<2x8x16xbf16>
    %72 = arith.truncf %64 : vector<16x16xf32> to vector<16x16xbf16>
    %73 = vector.shape_cast %72 : vector<16x16xbf16> to vector<2x8x16xbf16>
    "tpu.trace_start"() <{level = 10 : i32, message = "bik,bjk->bij"}> : () -> ()
    %cst_35 = arith.constant dense<0.000000e+00> : vector<2x8x8xf32>
    %74 = tpu.matmul %71, %73, %cst_35 {dimension_numbers = #tpu.dot_dimension_numbers<[2], [2], [1], [1], [0, 0, 0, 1, 1, 1], [0], [0]>} : vector<2x8x16xbf16>, vector<2x8x16xbf16>, vector<2x8x8xf32> -> vector<2x8x8xf32>
    "tpu.trace_stop"() : () -> ()
    %75 = arith.truncf %74 : vector<2x8x8xf32> to vector<2x8x8xbf16>
    %c0_36 = arith.constant 0 : index
    %c0_37 = arith.constant 0 : index
    %c0_38 = arith.constant 0 : index
    %76 = vector.load %arg9[%c0_36, %c0_37, %c0_38] : memref<2x8x8xbf16, #tpu.memory_space<vmem>>, vector<2x8x8xbf16>
    tpu.vector_store %arg9[%c0_36, %c0_37, %c0_38], %75 {strides = array<i32>} : memref<2x8x8xbf16, #tpu.memory_space<vmem>>, vector<2x8x8xbf16>,
    %cst_39 = arith.constant 0.000000e+00 : bf16
    %77 = vector.broadcast %cst_39 : bf16 to vector<2x8x128xbf16>
    %c0_40 = arith.constant 0 : index
    %c0_41 = arith.constant 0 : index
    %c0_42 = arith.constant 0 : index
    %78 = vector.load %arg10[%c0_40, %c0_41, %c0_42] : memref<2x8x128xbf16, #tpu.memory_space<vmem>>, vector<2x8x128xbf16>
    tpu.vector_store %arg10[%c0_40, %c0_41, %c0_42], %77 {strides = array<i32>} : memref<2x8x128xbf16, #tpu.memory_space<vmem>>, vector<2x8x128xbf16>,
    %79 = arith.truncf %64 : vector<16x16xf32> to vector<16x16xbf16>
    %80 = vector.shape_cast %79 : vector<16x16xbf16> to vector<2x8x16xbf16>
    %c0_43 = arith.constant 0 : index
    %c0_44 = arith.constant 0 : index
    %c0_45 = arith.constant 0 : index
    %81 = vector.load %arg10[%c0_43, %c0_44, %c0_45] : memref<2x8x128xbf16, #tpu.memory_space<vmem>>, vector<2x8x16xbf16>
    tpu.vector_store %arg10[%c0_43, %c0_44, %c0_45], %80 {strides = array<i32>} : memref<2x8x128xbf16, #tpu.memory_space<vmem>>, vector<2x8x16xbf16>,
    %82 = vector.shape_cast %18 : vector<16x32xbf16> to vector<2x8x32xbf16>
    %c0_46 = arith.constant 0 : index
    %c0_47 = arith.constant 0 : index
    %c16 = arith.constant 16 : index
    %83 = vector.load %arg10[%c0_46, %c0_47, %c16] : memref<2x8x128xbf16, #tpu.memory_space<vmem>>, vector<2x8x32xbf16>
    tpu.vector_store %arg10[%c0_46, %c0_47, %c16], %82 {strides = array<i32>} : memref<2x8x128xbf16, #tpu.memory_space<vmem>>, vector<2x8x32xbf16>,
    %84 = vector.shape_cast %69 : vector<16x16xbf16> to vector<2x8x16xbf16>
    %c0_48 = arith.constant 0 : index
    %c0_49 = arith.constant 0 : index
    %c48 = arith.constant 48 : index
    %85 = vector.load %arg10[%c0_48, %c0_49, %c48] : memref<2x8x128xbf16, #tpu.memory_space<vmem>>, vector<2x8x16xbf16>
    tpu.vector_store %arg10[%c0_48, %c0_49, %c48], %84 {strides = array<i32>} : memref<2x8x128xbf16, #tpu.memory_space<vmem>>, vector<2x8x16xbf16>,
    return
  }
  func.func @transform_0(%arg0: i32) -> (i32, i32, i32) {
    %c0_i32 = arith.constant 0 : i32
    %c0_i32_0 = arith.constant 0 : i32
    %c0_i32_1 = arith.constant 0 : i32
    return %arg0, %c0_i32, %c0_i32_0 : i32, i32, i32
  }
  func.func @transform_1(%arg0: i32) -> (i32, i32, i32) {
    %c0_i32 = arith.constant 0 : i32
    %c0_i32_0 = arith.constant 0 : i32
    %c0_i32_1 = arith.constant 0 : i32
    return %arg0, %c0_i32, %c0_i32_0 : i32, i32, i32
  }
  func.func @transform_2(%arg0: i32) -> (i32, i32, i32) {
    %c0_i32 = arith.constant 0 : i32
    %c0_i32_0 = arith.constant 0 : i32
    %c0_i32_1 = arith.constant 0 : i32
    return %arg0, %c0_i32, %c0_i32_0 : i32, i32, i32
  }
  func.func @transform_3(%arg0: i32) -> (i32, i32) {
    %c0_i32 = arith.constant 0 : i32
    %c0_i32_0 = arith.constant 0 : i32
    %c0_i32_1 = arith.constant 0 : i32
    return %c0_i32, %c0_i32_0 : i32, i32
  }
  func.func @transform_4(%arg0: i32) -> (i32, i32) {
    %c0_i32 = arith.constant 0 : i32
    %c0_i32_0 = arith.constant 0 : i32
    %c0_i32_1 = arith.constant 0 : i32
    return %c0_i32, %c0_i32_0 : i32, i32
  }
  func.func @transform_5(%arg0: i32) -> (i32, i32) {
    %c0_i32 = arith.constant 0 : i32
    %c0_i32_0 = arith.constant 0 : i32
    %c0_i32_1 = arith.constant 0 : i32
    return %c0_i32, %c0_i32_0 : i32, i32
  }
  func.func @transform_6(%arg0: i32) -> (i32, i32) {
    %c0_i32 = arith.constant 0 : i32
    %c0_i32_0 = arith.constant 0 : i32
    %c0_i32_1 = arith.constant 0 : i32
    return %c0_i32, %c0_i32_0 : i32, i32
  }
  func.func @transform_7(%arg0: i32) -> (i32, i32, i32) {
    %c0_i32 = arith.constant 0 : i32
    %c0_i32_0 = arith.constant 0 : i32
    %c0_i32_1 = arith.constant 0 : i32
    return %arg0, %c0_i32, %c0_i32_0 : i32, i32, i32
  }
  func.func @transform_8(%arg0: i32) -> (i32, i32, i32) {
    %c0_i32 = arith.constant 0 : i32
    %c0_i32_0 = arith.constant 0 : i32
    %c0_i32_1 = arith.constant 0 : i32
    return %arg0, %c0_i32, %c0_i32_0 : i32, i32, i32
  }
  func.func @transform_9(%arg0: i32) -> (i32, i32, i32) {
    %c0_i32 = arith.constant 0 : i32
    %c0_i32_0 = arith.constant 0 : i32
    %c0_i32_1 = arith.constant 0 : i32
    return %arg0, %c0_i32, %c0_i32_0 : i32, i32, i32
  }
}

</mosaic_0001>

<bundles_post_ra>
// kernel: tpu_custom_call.1
= control target key start
LH: loop header
LB: loop body
LE: loop exit
PB: predicated region body
PF: predicated region fallthrough
CT: control target
= control target key end

     0   :  { %15 = vsyncpa [#allocation3], 0  ;;  %s1184_s0 = inlined_call_operand.vmem [shape: f32[2,8,16], index: 0, kind: input, shape index: {}]   ;;  %s1185_s1 = inlined_call_operand.hbm [shape: f32[2,8,16], index: 1, kind: input, shape index: {}]   ;;  %s1186_s2 = inlined_call_operand.hbm [shape: f32[2,1,8], index: 2, kind: input, shape index: {}]   ;;  %s1187_s3 = inlined_call_operand.vmem [shape: bf16[16,64], index: 3, kind: input, shape index: {}]   ;;  %s1188_s4 = inlined_call_operand.vmem [shape: f32[1,64], index: 4, kind: input, shape index: {}]   ;;  %s1189_s5 = inlined_call_operand.vmem [shape: bf16[32,16], index: 5, kind: input, shape index: {}]   ;;  %s1190_s6 = inlined_call_operand.vmem [shape: f32[1,16], index: 6, kind: input, shape index: {}]   ;;  %s1191_s7 = inlined_call_operand.hbm [shape: bf16[2,8,8], index: 7, kind: output, shape index: {0}]   ;;  %s1192_s8 = inlined_call_operand.hbm [shape: bf16[2,8,8], index: 8, kind: output, shape index: {1}]   ;;  %s1193_s9 = inlined_call_operand.hbm [shape: bf16[2,8,128], index: 9, kind: output, shape index: {2}]  }
   0x1   :  { %16 = vsyncpa [#allocation6], 0 }
   0x2   :  { %17 = vsyncpa [#allocation4], 0 }
   0x3   :  { %18 = vsyncpa [#allocation9], 0  ;;  %s997_s30 = smov [#allocation2]  }
   0x4   :  { %s26_s10 = sshll.u32 %s997_s30, 4  ;;  %s27_s10 = int_to_ptr.vmem [resolvable:$true] %s26_s10 }
   0x5   :  { %s897_s11 = scalar_lea.vmem %s27_s10, 256  ;;  %p902_p1 = scmp.lt.s32.totalorder %s27_s10, %s27_s10 }
   0x6   :  { %p898_p0 = scmp.ne.s32.totalorder %s27_s10, %s897_s11  ;;  %p903_p2 = scmp.lt.s32.totalorder %s897_s11, %s897_s11 }
   0x8   :  { %p904_p3 = por %p903_p2, %p902_p1 }
   0xa   :  { %p905_p4 = pnand %p904_p3, %p898_p0 }
   0xc   :  { %908 = shalt.err (!%p905_p4)
}
   0xd   :  { %s998_s12 = smov 128   ;;  %s999_s13 = smov 8  }
   0xe   :  { %32 = dma.hbm_to_vmem [thread:$0]  %s1185_s1, 256, %s27_s10, [#allocation3], %s998_s12, %s998_s12, %s999_s13  }
   0xf   :  { %s1000_s16 = smov [#allocation5]  }
  0x10   :  { %s38_s17 = sshll.u32 %s1000_s16, 4  ;;  %s39_s17 = int_to_ptr.vmem [resolvable:$true] %s38_s17 }
  0x11   :  { %s917_s18 = scalar_lea.vmem %s39_s17, 32  ;;  %p922_p6 = scmp.lt.s32.totalorder %s39_s17, %s39_s17 }
  0x12   :  { %p918_p5 = scmp.ne.s32.totalorder %s39_s17, %s917_s18  ;;  %p923_p7 = scmp.lt.s32.totalorder %s917_s18, %s917_s18 }
  0x14   :  { %p924_p8 = por %p923_p7, %p922_p6 }
  0x16   :  { %p925_p9 = pnand %p924_p8, %p918_p5 }
  0x18   :  { %928 = shalt.err (!%p925_p9)
}
  0x19   :  { %s1001_s19 = smov 16   ;;  %s1002_s20 = smov 1  }
  0x1a   :  { %44 = dma.hbm_to_vmem [thread:$0]  %s1186_s2, 32, %s39_s17, [#allocation6], %s1001_s19, %s1001_s19, %s1002_s20  }
  0x1b   :  { %989 = dma.done.wait [#allocation3], 256  }
  0x1c   :  { %990 = vsyncadd [#allocation3], 4294967040 }
  0x1d   :  { %991 = dma.done.wait [#allocation6], 32  }
  0x1e   :  { %992 = vsyncadd [#allocation6], 4294967264  ;;  %v1003_v0 = vmov 0.0   ;;  %vm1004_vm0 = vmmov 0   ;;  %v878_v1 = vld [vmem:[%s1187_s3] sm:$0xff]   ;;  %v61_v3 = vld [vmem:[%s1184_s0 + $0x8] sm:$0xff] }
  0x1f   :  { %799 = vmatprep.subr.bf16.mxu0 %v1003_v0  ;;  %801 = vmatprep.mubr.msk.bf16.mxu0 %vm1004_vm0, %v1003_v0  ;;  %v60_v2 = vld [vmem:[%s1184_s0] sm:$0xff]  ;;  %vm78_vm1 = vcmask 130048   ;;  %vm168_vm2 = vcmask 261120   ;;  %s1005_s0 = smov 96   ;;  %v776_v16 = vld [vmem:[#allocation5] ss:$0 sm:$0xff] }
  0x20   :  { %805 = vmatprep.subr.bf16.mxu1 %v1003_v0  ;;  %807 = vmatprep.mubr.msk.bf16.mxu1 %vm1004_vm0, %v1003_v0  ;;  %v62_v4 = vpack.c.bf16 %v61_v3, %v60_v2  ;;  %v741_v5 = vld [vmem:[%s1188_s4] ss:$0 sm:$0xff]  ;;  %v777_v19 = vld [vmem:[#allocation5 + $0x1] ss:$0 sm:$0xff]  ;;  %vm386_vm3 = vcmask 1043456   ;;  %vm257_vm4 = vcmask 60416  }
  0x21   :  { %800 = vmatpush3.bf16.msra.mxu0 %v878_v1  ;;  %145 = vbcast.lane.b32.xlu1 %v776_v16, 256  ;;  %vm356_vm6 = vcmask 64512   ;;  %s1006_s4 = smov 112   ;;  %vm661_vm11 = vcmask 125952   ;;  %vm675_vm12 = vcmask 388224   ;;  %s1009_s12 = smov [#allocation7]  }
  0x22   :  { %811 = vmatprep.subr.bf16.mxu0 %v1003_v0  ;;  %s697_s13 = sshll.u32 %s1009_s12, 4  ;;  %s698_s13 = int_to_ptr.vmem [resolvable:$true] %s697_s13 }
  0x23   :  { %s929_s14 = scalar_lea.vmem %s698_s13, 128  ;;  %p934_p11 = scmp.lt.s32.totalorder %s698_s13, %s698_s13 }
  0x24   :  { %802 = vmatmul.mubr.msk.bf16.vlgmr.msra.gmra.mxu0 %vm78_vm1, %v62_v4  ;;  %p930_p10 = scmp.ne.s32.totalorder %s698_s13, %s929_s14  ;;  %p935_p12 = scmp.lt.s32.totalorder %s929_s14, %s929_s14 }
  0x25   :  { %813 = vmatprep.mubr.msk.bf16.mxu0 %vm1004_vm0, %v1003_v0  ;;  %152 = vbcast.lane.b32.xlu1 %v777_v19, 256 }
  0x26   :  { %p936_p13 = por %p935_p12, %p934_p11 }
  0x28   :  { %p937_p0 = pnand %p936_p13, %p930_p10 }
  0x93   :  { %v146_v36 = vpop.permute.xlu1 %145 }
  0x94   :  { %v166_v37 = vmul.f32 %v776_v16, %v146_v36  ;;  %v880_v16 = vld [vmem:[%s1189_s5] sm:$0xff]  }
  0x96   :  { %vm352_vm5 = vcmp.lt.f32.partialorder %v166_v37, 0.5 }
  0x97   :  { %v153_v38 = vpop.permute.xlu1 %152 }
  0x98   :  { %v167_v40 = vmul.f32 %v777_v19, %v153_v38 }
  0x9a   :  { %vm353_vm7 = vcmp.lt.f32.partialorder %v167_v40, 0.5 }
  0xe4   :  { %v116_v6 = vpop.f32.mrf.mxu0 }
  0xe5   :  { %v1092_v7 = vadd.f32 %v741_v5, %v116_v6 }
  0xe6   :  { %v803_v8 = vpop.f32.mrf.mxu0 }
  0xe7   :  { %v123_v9 = vmax.f32 %v1092_v7, 0.0  ;;  %vm125_vm8 = vcmp.gt.f32.partialorder %v1092_v7, 0.0 }
  0xe8   :  { %v119_v10 = vpop.f32.mrf.mxu0  ;;  %v744_v54 = vsel %vm125_vm8, 1.0, %v1003_v0 }
  0xe9   :  { %v768_v11 = vpack.c.bf16 %v123_v9, %v123_v9  ;;  %v1095_v12 = vadd.f32 %v741_v5, %v119_v10  ;;  %v772_v55 = vpack.c.bf16 %v744_v54, %v744_v54 }
  0xea   :  { %v804_v13 = vpop.f32.mrf.mxu0 }
  0xeb   :  { %v124_v14 = vmax.f32 %v1095_v12, 0.0  ;;  %260 = vrot.lane.b32.xlu0 %v768_v11, %s1005_s0  ;;  %v170_v15 = vsel %vm168_vm2, %v768_v11, 0  ;;  %vm126_vm9 = vcmp.gt.f32.partialorder %v1095_v12, 0.0 }
  0xec   :  { %806 = vmatpush3.bf16.xpose.msra.mxu1 %v170_v15  ;;  %v745_v3 = vsel %vm126_vm9, 1.0, %v1003_v0  ;;  %v879_v15 = vld [vmem:[%s1189_s5 + $0x8] sm:$0xff]  }
  0xed   :  { %v769_v17 = vpack.c.bf16 %v124_v14, %v124_v14  ;;  %817 = vmatprep.subr.bf16.mxu1 %v1003_v0  ;;  %v773_v4 = vpack.c.bf16 %v745_v3, %v745_v3 }
  0xef   :  { %305 = vrot.lane.b32.xlu0 %v769_v17, %s1005_s0  ;;  %v213_v18 = vsel %vm168_vm2, %v769_v17, 0 }
  0xf0   :  { %812 = vmatpush3.bf16.xpose.msra.mxu0 %v213_v18 }
  0xf1   :  { %823 = vmatprep.subr.bf16.mxu0 %v1003_v0 }
  0xf3   :  { %808 = vmatmul.mubr.msk.bf16.vlgmr.msra.gmra.mxu1 %vm168_vm2, %v768_v11 }
  0xf4   :  { %819 = vmatprep.mubr.msk.bf16.mxu1 %vm1004_vm0, %v1003_v0 }
  0xf7   :  { %814 = vmatmul.mubr.msk.bf16.vlgmr.msra.gmra.mxu0 %vm168_vm2, %v769_v17 }
  0xf8   :  { %825 = vmatprep.mubr.msk.bf16.mxu0 %vm1004_vm0, %v1003_v0 }
 0x15d   :  { %v261_v20 = vpop.permute.xlu0 %260 }
 0x15e   :  { %v263_v21 = vsel %vm168_vm2, %v261_v20, 0  ;;  %v387_v24 = vsel %vm386_vm3, %v261_v20, 0 }
 0x15f   :  { %818 = vmatpush3.bf16.xpose.msra.mxu1 %v263_v21 }
 0x160   :  { %829 = vmatprep.subr.bf16.mxu1 %v1003_v0 }
 0x161   :  { %v306_v22 = vpop.permute.xlu0 %305 }
 0x162   :  { %v308_v23 = vsel %vm168_vm2, %v306_v22, 0  ;;  %v432_v25 = vsel %vm386_vm3, %v306_v22, 0 }
 0x163   :  { %824 = vmatpush3.bf16.xpose.msra.mxu0 %v308_v23 }
 0x164   :  { %835 = vmatprep.subr.bf16.mxu0 %v1003_v0 }
 0x166   :  { %820 = vmatmul.mubr.msk.bf16.vlgmr.msra.gmra.mxu1 %vm168_vm2, %v768_v11 }
 0x167   :  { %830 = vmatpush3.bf16.msra.mxu1 %v387_v24  ;;  %831 = vmatprep.mubr.msk.bf16.mxu1 %vm1004_vm0, %v1003_v0 }
 0x168   :  { %841 = vmatprep.subr.bf16.mxu1 %v1003_v0 }
 0x16a   :  { %826 = vmatmul.mubr.msk.bf16.vlgmr.msra.gmra.mxu0 %vm168_vm2, %v769_v17 }
 0x16b   :  { %836 = vmatpush3.bf16.msra.mxu0 %v432_v25  ;;  %837 = vmatprep.mubr.msk.bf16.mxu0 %vm1004_vm0, %v1003_v0 }
 0x16c   :  { %849 = vmatprep.subr.bf16.mxu0 %v1003_v0 }
 0x1b3   :  { %v206_v26 = vpop.f32.mrf.mxu1 }
 0x1b4   :  { %v255_v27 = vpack.c.bf16 %v206_v26, %v206_v26  ;;  %v1007_v26 = vmov 0  }
 0x1b5   :  { %v809_v28 = vpop.f32.mrf.mxu1  ;;  %659 = vst [vmem:[#allocation10] sm:$0xf] %v1007_v26  ;;  %660 = vst [vmem:[#allocation10 + $0x4] sm:$0xf] %v1007_v26 }
 0x1b6   :  { %258 = vst.msk [vmem:[#allocation7] sm:$0xf] %vm257_vm4, %v255_v27  ;;  %v754_v27 = vld [vmem:[%s1190_s6] ss:$0 sm:$0xff]  ;;  %s1008_s6 = smov 48  }
 0x1b7   :  { %v209_v29 = vpop.f32.mrf.mxu1  ;;  %v249_v30 = vpop.f32.mrf.mxu0 }
 0x1b8   :  { %v256_v31 = vpack.c.bf16 %v249_v30, %v249_v30 }
 0x1b9   :  { %v810_v32 = vpop.f32.mrf.mxu1  ;;  %v815_v33 = vpop.f32.mrf.mxu0 }
 0x1ba   :  { %259 = vst.msk [vmem:[#allocation7 + $0x4] sm:$0xf] %vm257_vm4, %v256_v31 }
 0x1bb   :  { %v252_v34 = vpop.f32.mrf.mxu0 }
 0x1bd   :  { %v816_v35 = vpop.f32.mrf.mxu0 }
 0x226   :  { %v299_v39 = vpop.f32.mrf.mxu1 }
 0x227   :  { %v350_v41 = vmul.f32 0.17677669, %v299_v39 }
 0x228   :  { %v821_v42 = vpop.f32.mrf.mxu1 }
 0x229   :  { %v354_v43 = vsel %vm352_vm5, -1e+30, %v350_v41  ;;  %v551_v42 = vld [vmem:[#allocation2] sm:$0xff] }
 0x22a   :  { %v302_v44 = vpop.f32.mrf.mxu1  ;;  %v344_v45 = vpop.f32.mrf.mxu0  ;;  %v357_v46 = vsel %vm356_vm6, %v354_v43, -inf }
 0x22b   :  { %v351_v47 = vmul.f32 0.17677669, %v344_v45  ;;  %358 = vmax.xlane.f32.xlu0 %v357_v46 }
 0x22c   :  { %v822_v48 = vpop.f32.mrf.mxu1  ;;  %v827_v49 = vpop.f32.mrf.mxu0 }
 0x22d   :  { %v355_v50 = vsel %vm353_vm7, -1e+30, %v351_v47  ;;  %v553_v47 = vpack.c.bf16 %v551_v42, %v551_v42  ;;  %v552_v48 = vld [vmem:[#allocation2 + $0x8] sm:$0xff] }
 0x22e   :  { %v347_v51 = vpop.f32.mrf.mxu0  ;;  %v360_v52 = vsel %vm356_vm6, %v355_v50, -inf }
 0x22f   :  { %361 = vmax.xlane.f32.xlu1 %v360_v52 }
 0x230   :  { %v828_v53 = vpop.f32.mrf.mxu0 }
 0x240   :  { %669 = vrot.lane.b32.xlu1 %v772_v55, %s1006_s4 }
 0x2b4   :  { %v359_v56 = vpop.xlane.xlu0 %358 }
 0x2b5   :  { %v363_v57 = vsub.f32 %v354_v43, %v359_v56 }
 0x2b7   :  { %v365_v58 = vmul.f32 1.442695, %v363_v57 }
 0x2b8   :  { %v362_v59 = vpop.xlane.xlu1 %361 }
 0x2b9   :  { %881 = vpow2.f32 %v365_v58  ;;  %v364_v60 = vsub.f32 %v355_v50, %v362_v59 }
 0x2bb   :  { %v367_v61 = vmul.f32 1.442695, %v364_v60 }
 0x2bc   :  { %v670_v38 = vpop.permute.xlu1 %669 }
 0x2bd   :  { %883 = vpow2.f32 %v367_v61 }
 0x2c6   :  { %v882_v62 = vpop.eup %881 }
 0x2c7   :  { %v369_v63 = vsel %vm356_vm6, %v882_v62, 0.0 }
 0x2c8   :  { %370 = vadd.xlane.f32.xlu0 %v369_v63 }
 0x2ca   :  { %v884_v1 = vpop.eup %883 }
 0x2cb   :  { %v372_v2 = vsel %vm356_vm6, %v884_v1, 0.0 }
 0x2cc   :  { %373 = vadd.xlane.f32.xlu0 %v372_v2 }
 0x2e2   :  { %671 = vrot.lane.b32.xlu0 %v773_v4, %s1006_s4 }
 0x351   :  { %v371_v5 = vpop.xlane.xlu0 %370 }
 0x352   :  { %885 = vrcp.f32 %v371_v5 }
 0x355   :  { %v374_v6 = vpop.xlane.xlu0 %373 }
 0x356   :  { %887 = vrcp.f32 %v374_v6 }
 0x359   :  { %v672_v45 = vpop.permute.xlu0 %671 }
 0x35f   :  { %v886_v7 = vpop.eup %885 }
 0x360   :  { %v377_v8 = vmul.f32 %v886_v7, %v882_v62 }
 0x362   :  { %v379_v9 = vsel %vm352_vm5, 0.0, %v377_v8 }
 0x363   :  { %v888_v10 = vpop.eup %887  ;;  %v381_v11 = vpack.c.bf16 %v379_v9, %v379_v9 }
 0x364   :  { %v378_v13 = vmul.f32 %v888_v10, %v884_v1 }
 0x365   :  { %832 = vmatmul.mubr.msk.bf16.vlgmr.msra.gmra.mxu1 %vm356_vm6, %v381_v11 }
 0x366   :  { %v380_v14 = vsel %vm353_vm7, 0.0, %v378_v13  ;;  %845 = vmatprep.mubr.msk.bf16.mxu1 %vm1004_vm0, %v1003_v0  ;;  %842 = vmatpush3.bf16.msra.mxu1 %v879_v15 }
 0x367   :  { %v382_v12 = vpack.c.bf16 %v380_v14, %v380_v14  ;;  %843 = vmatprep.subr.bf16.mxu1 %v1003_v0 }
 0x369   :  { %838 = vmatmul.mubr.msk.bf16.vlgmr.msra.gmra.mxu0 %vm356_vm6, %v382_v12 }
 0x36a   :  { %851 = vmatprep.mubr.msk.bf16.mxu0 %vm1004_vm0, %v1003_v0  ;;  %844 = vmatpush3.bf16.msra.mxu1 %v880_v16 }
 0x36b   :  { %855 = vmatprep.subr.bf16.mxu1 %v1003_v0 }
 0x425   :  { %v423_v17 = vpop.f32.mrf.mxu1 }
 0x427   :  { %v833_v18 = vpop.f32.mrf.mxu1 }
 0x429   :  { %v426_v19 = vpop.f32.mrf.mxu1  ;;  %v468_v20 = vpop.f32.mrf.mxu0 }
 0x42a   :  { %v474_v21 = vpack.c.bf16 %v468_v20, %v423_v17 }
 0x42b   :  { %v834_v22 = vpop.f32.mrf.mxu1  ;;  %v839_v23 = vpop.f32.mrf.mxu0 }
 0x42c   :  { %846 = vmatmul.mubr.msk.bf16.vlgmr.msra.gmra.mxu1 %vm168_vm2, %v474_v21 }
 0x42d   :  { %v471_v24 = vpop.f32.mrf.mxu0  ;;  %857 = vmatprep.mubr.msk.bf16.mxu1 %vm1004_vm0, %v1003_v0 }
 0x42f   :  { %v840_v25 = vpop.f32.mrf.mxu0 }
 0x4ec   :  { %v535_v28 = vpop.f32.mrf.mxu1 }
 0x4ed   :  { %v536_v29 = vadd.f32 %v754_v27, %v535_v28 }
 0x4ee   :  { %v847_v30 = vpop.f32.mrf.mxu1 }
 0x4ef   :  { %v542_v31 = vmax.f32 %v536_v29, 0.0  ;;  %vm544_vm10 = vcmp.gt.f32.partialorder %v536_v29, 0.0 }
 0x4f0   :  { %v758_v32 = vsel %vm544_vm10, 1.0, %v1003_v0  ;;  %v538_v33 = vpop.f32.mrf.mxu1 }
 0x4f1   :  { %v770_v34 = vpack.c.bf16 %v542_v31, %v542_v31  ;;  %v774_v35 = vpack.c.bf16 %v758_v32, %v758_v32  ;;  %v539_v36 = vadd.f32 %v754_v27, %v538_v33 }
 0x4f2   :  { %v848_v37 = vpop.f32.mrf.mxu1 }
 0x4f3   :  { %662 = vst.msk [vmem:[#allocation10] sm:$0xf] %vm661_vm11, %v770_v34  ;;  %v543_v39 = vmax.f32 %v539_v36, 0.0  ;;  %vm545_vm13 = vcmp.gt.f32.partialorder %v539_v36, 0.0  ;;  %683 = vrot.lane.b32.xlu1 %v774_v35, %s1008_s6  ;;  %v567_v40 = vsel %vm78_vm1, %v770_v34, 0 }
 0x4f4   :  { %v759_v41 = vsel %vm545_vm13, 1.0, %v1003_v0  ;;  %850 = vmatpush3.bf16.xpose.msra.mxu0 %v567_v40  ;;  %676 = vst.msk [vmem:[#allocation10] sm:$0xf] %vm675_vm12, %v670_v38  ;;  %v554_v0 = vpack.c.bf16 %v552_v48, %v552_v48 }
 0x4f5   :  { %v771_v43 = vpack.c.bf16 %v543_v39, %v543_v39  ;;  %v775_v44 = vpack.c.bf16 %v759_v41, %v759_v41 }
 0x4f7   :  { %663 = vst.msk [vmem:[#allocation10 + $0x4] sm:$0xf] %vm661_vm11, %v771_v43  ;;  %685 = vrot.lane.b32.xlu1 %v775_v44, %s1008_s6  ;;  %v613_v46 = vsel %vm78_vm1, %v771_v43, 0 }
 0x4f8   :  { %856 = vmatpush3.bf16.xpose.msra.mxu1 %v613_v46  ;;  %677 = vst.msk [vmem:[#allocation10 + $0x4] sm:$0xf] %vm675_vm12, %v672_v45 }
 0x4fb   :  { %852 = vmatmul.mubr.msk.bf16.vlgmr.msra.gmra.mxu0 %vm78_vm1, %v553_v47 }
 0x4ff   :  { %858 = vmatmul.mubr.msk.bf16.vlgmr.msra.gmra.mxu1 %vm78_vm1, %v554_v0 }
 0x500   :  { %940 = shalt.err (!%p937_p0)
}
 0x501   :  { %s1010_s15 = smov 64   ;;  %s1011_s16 = smov 4   ;;  %vm689_vm14 = vcmask 519552  }
 0x502   :  { %703 = dma.vmem_to_hbm [thread:$0]  %s698_s13, 128, %s1191_s7, [#allocation4], %s1010_s15, %s1010_s15, %s1011_s16  }
 0x503   :  { %s1012_s19 = smov [#allocation8]   ;;  %s1013_s21 = smov [#allocation10]  }
 0x504   :  { %s709_s20 = sshll.u32 %s1012_s19, 4  ;;  %s721_s22 = sshll.u32 %s1013_s21, 4  ;;  %s710_s20 = int_to_ptr.vmem [resolvable:$true] %s709_s20  ;;  %s722_s22 = int_to_ptr.vmem [resolvable:$true] %s721_s22 }
 0x505   :  { %s949_s7 = scalar_lea.vmem %s710_s20, 128  ;;  %p954_p2 = scmp.lt.s32.totalorder %s710_s20, %s710_s20 }
 0x506   :  { %p950_p1 = scmp.ne.s32.totalorder %s710_s20, %s949_s7  ;;  %p955_p3 = scmp.lt.s32.totalorder %s949_s7, %s949_s7 }
 0x508   :  { %p956_p4 = por %p955_p3, %p954_p2 }
 0x50a   :  { %p957_p5 = pnand %p956_p4, %p950_p1 }
 0x565   :  { %v684_v49 = vpop.permute.xlu1 %683 }
 0x566   :  { %690 = vst.msk [vmem:[#allocation10] sm:$0xf] %vm689_vm14, %v684_v49 }
 0x569   :  { %v686_v50 = vpop.permute.xlu1 %685 }
 0x56a   :  { %691 = vst.msk [vmem:[#allocation10 + $0x4] sm:$0xf] %vm689_vm14, %v686_v50 }
 0x5bb   :  { %v603_v51 = vpop.f32.mrf.mxu0 }
 0x5bc   :  { %v655_v52 = vpack.c.bf16 %v603_v51, %v603_v51 }
 0x5bd   :  { %v853_v53 = vpop.f32.mrf.mxu0 }
 0x5be   :  { %657 = vst.msk [vmem:[#allocation8] sm:$0xf] %vm257_vm4, %v655_v52 }
 0x5bf   :  { %v606_v54 = vpop.f32.mrf.mxu0  ;;  %v649_v55 = vpop.f32.mrf.mxu1 }
 0x5c0   :  { %v656_v56 = vpack.c.bf16 %v649_v55, %v649_v55 }
 0x5c1   :  { %v854_v57 = vpop.f32.mrf.mxu0  ;;  %v859_v58 = vpop.f32.mrf.mxu1 }
 0x5c2   :  { %658 = vst.msk [vmem:[#allocation8 + $0x4] sm:$0xf] %vm257_vm4, %v656_v56 }
 0x5c3   :  { %v652_v59 = vpop.f32.mrf.mxu1 }
 0x5c4   :  { %960 = shalt.err (!%p957_p5)
}
 0x5c5   :  { %715 = dma.vmem_to_hbm [thread:$0]  %s710_s20, 128, %s1192_s8, [#allocation9], %s1010_s15, %s1010_s15, %s1011_s16  }
 0x5c6   :  { %s969_s2 = scalar_lea.vmem %s722_s22, 128  ;;  %p974_p7 = scmp.lt.s32.totalorder %s722_s22, %s722_s22 }
 0x5c7   :  { %p970_p6 = scmp.ne.s32.totalorder %s722_s22, %s969_s2  ;;  %p975_p8 = scmp.lt.s32.totalorder %s969_s2, %s969_s2 }
 0x5c9   :  { %p976_p9 = por %p975_p8, %p974_p7 }
 0x5cb   :  { %p977_p10 = pnand %p976_p9, %p970_p6 }
 0x5cd   :  { %980 = shalt.err (!%p977_p10)
}
 0x5ce   :  { %727 = dma.vmem_to_hbm [thread:$0]  %s722_s22, 128, %s1193_s9, [#allocation9], %s1010_s15, %s1010_s15, %s1011_s16   ;;  %v860_v60 = vpop.f32.mrf.mxu1 }
 0x5cf   :  { %993 = dma.done.wait [#allocation4], 128  }
 0x5d0   :  { %994 = vsyncadd [#allocation4], 4294967168 }
 0x5d1   :  { %995 = dma.done.wait [#allocation9], 256  }
 0x5d2   :  { %996 = vsyncadd [#allocation9], 4294967040 }
 0x5d3   :  { %737 = vsyncpa [#allocation3], 1 }
 0x5d4   :  { %738 = vsyncpa [#allocation6], 1 }
 0x5d5   :  { %739 = vsyncpa [#allocation4], 1 }
 0x5d6   :  { %740 = vsyncpa [#allocation9], 1 }

</bundles_post_ra>
